<compile_context>
chip_gen: v7x
topology: tpu7x:2x2x1
jax: 0.10.0
libtpu: 0.0.40
codegen_flags: <defaults>
</compile_context>

<pallas_src>
import jax
import jax.numpy as jnp
from jax import lax
from jax.experimental import pallas as pl
from jax.experimental.pallas import tpu as pltpu


def _leaky_relu(x, slope=0.2):            # reference module: LeakyReLU(0.2)
    return jnp.where(x > 0, x, slope * x)


# --------------------------------------------------------------------------
# Kernel 1: per-utterance K/V projection (K stored transposed, bf16 in HBM)
# --------------------------------------------------------------------------
def _kv_proj_kernel(lo_ref, wk_ref, bk_ref, wv_ref, bv_ref, kT_ref, v_ref):
    lo = lo_ref[0].astype(jnp.bfloat16)                       # (tT, Dl) bf16 operand

    # key projection: bf16 x bf16 -> f32 accumulate, f32 bias + leaky-relu
    k = _leaky_relu(
        jnp.dot(lo, wk_ref[...], preferred_element_type=jnp.float32)
        + bk_ref[...])                                        # (tT, Kq) f32
    # one XLU transpose per tile, paid once per utterance; removes the
    # per-decoder-step relayout of K in the energy matmul.
    kT_ref[0] = jnp.transpose(k).astype(jnp.bfloat16)         # (Kq, tT) bf16

    # value projection
    v = _leaky_relu(
        jnp.dot(lo, wv_ref[...], preferred_element_type=jnp.float32)
        + bv_ref[...])                                        # (tT, C) f32
    v_ref[0] = v.astype(jnp.bfloat16)                         # bf16 in HBM


def precompute_kv(listener_output, wk, bk, wv, bv, *, block_t=512):
    """Per-utterance work: in a real decode loop this is called once and the
    bf16 K^T / V are reused by every `attention_step`."""
    B, T, Dl = listener_output.shape
    Kq = wk.shape[1]
    C = wv.shape[1]

    # T tiling: full T for small inputs, otherwise a tile that divides T so
    # double-buffered (tT,Dl)+(Kq,tT)+(tT,C) blocks fit the per-chip VMEM
    # budget (64 MiB physical on v7x, 16 MiB scoped default on v5e).
    # TODO(synk): pad T outside for non-power-of-two production lengths;
    #             on v6e/v7x prefer tT a multiple of 256 to fill the 256x256 MXU.
    if T <= block_t:
        tT = T
    else:
        tT = block_t
        while T % tT != 0:
            tT //= 2
    n_t = T // tT

    kT, v = pl.pallas_call(
        _kv_proj_kernel,
        grid=(B, n_t),
        in_specs=[
            pl.BlockSpec((1, tT, Dl), lambda b, t: (b, t, 0)),
            pl.BlockSpec((Dl, Kq), lambda b, t: (0, 0)),      # resident weights
            pl.BlockSpec((1, Kq), lambda b, t: (0, 0)),
            pl.BlockSpec((Dl, C), lambda b, t: (0, 0)),
            pl.BlockSpec((1, C), lambda b, t: (0, 0)),
        ],
        out_specs=(
            pl.BlockSpec((1, Kq, tT), lambda b, t: (b, 0, t)),
            pl.BlockSpec((1, tT, C), lambda b, t: (b, t, 0)),
        ),
        out_shape=(jax.ShapeDtypeStruct((B, Kq, T), jnp.bfloat16),
                   jax.ShapeDtypeStruct((B, T, C), jnp.bfloat16)),
        compiler_params=pltpu.CompilerParams(
            dimension_semantics=("parallel", "parallel"),
            # explicit scoped-VMEM budget: >= every chip's default, safe on all
            # generations (re-derive per chip for production tile sizes).
            vmem_limit_bytes=32 * 1024 * 1024),
    )(listener_output, wk.astype(jnp.bfloat16), bk,
      wv.astype(jnp.bfloat16), bv)
    return kT, v


# --------------------------------------------------------------------------
# Kernel 2: batched query projection (hoisted out of the per-batch grid)
# --------------------------------------------------------------------------
def _q_proj_kernel(dec_ref, wq_ref, bq_ref, q_ref):
    dec = dec_ref[...].astype(jnp.bfloat16)                   # (B, Ds)
    q_ref[...] = _leaky_relu(
        jnp.dot(dec, wq_ref[...], preferred_element_type=jnp.float32)
        + bq_ref[...])                                        # (B, Kq) f32


def project_query(decoder_state, wq, bq):
    B, Ds = decoder_state.shape
    Kq = wq.shape[1]
    return pl.pallas_call(
        _q_proj_kernel,
        grid=(1,),
        in_specs=[
            pl.BlockSpec((B, Ds), lambda i: (0, 0)),
            pl.BlockSpec((Ds, Kq), lambda i: (0, 0)),
            pl.BlockSpec((1, Kq), lambda i: (0, 0)),
        ],
        out_specs=pl.BlockSpec((B, Kq), lambda i: (0, 0)),
        out_shape=jax.ShapeDtypeStruct((B, Kq), jnp.float32),
        compiler_params=pltpu.CompilerParams(
            dimension_semantics=("arbitrary",)),
    )(decoder_state, wq.astype(jnp.bfloat16), bq)


# --------------------------------------------------------------------------
# Kernel 3: per-decoder-step attention (streams bf16 K^T / V)
# --------------------------------------------------------------------------
def _attn_step_kernel(lengths_ref,                            # scalar-prefetch (SMEM)
                      q_ref, kT_ref, v_ref, ctx_ref, attn_ref):
    b = pl.program_id(0)
    length = lengths_ref[b]                                   # scalar int32 from SMEM

    q = q_ref[...].astype(jnp.bfloat16)                       # (1, Kq)
    kT = kT_ref[0]                                            # (Kq, T) bf16
    v = v_ref[0]                                              # (T, C)  bf16

    # energy: plain (1,Kq)@(Kq,T) matmul — K was pre-transposed per utterance,
    # so there is no per-step relayout.
    energy = jnp.dot(q, kT, preferred_element_type=jnp.float32)   # (1, T) f32

    # Length mask folded into the softmax; mathematically identical to
    # softmax -> mask -> L1-renormalize (F.normalize, p=1) incl. the eps-guard
    # that returns zeros for length == 0.
    T = energy.shape[-1]
    t_idx = lax.broadcasted_iota(jnp.int32, (1, T), 1)
    valid = t_idx < length
    m = jnp.max(jnp.where(valid, energy, jnp.float32(-1e30)),
                axis=-1, keepdims=True)
    p = jnp.where(valid, jnp.exp(energy - m), jnp.float32(0.0))
    denom = jnp.sum(p, axis=-1, keepdims=True)
    # exact reciprocal: it is one (1,1) scalar per grid step, costs nothing.
    attn = p * pl.reciprocal(jnp.maximum(denom, jnp.float32(1e-12)),
                             approx=False)                    # (1, T) f32

    # context = attn @ value  (bf16 operands, f32 accumulation)
    ctx = jnp.dot(attn.astype(jnp.bfloat16), v,
                  preferred_element_type=jnp.float32)         # (1, C) f32

    ctx_ref[...] = ctx
    attn_ref[...] = attn
    # TODO(synk): for production T that exceeds the VMEM budget, add a T-chunk
    # grid axis ("arbitrary") with flash-style online max/denominator scratch,
    # use the prefetched lengths to skip dead chunks, and consider
    # pipeline_mode=pl.Buffered(3) on the K/V specs.


def attention_step(q, kT, v, lengths):
    B, Kq, T = kT.shape
    C = v.shape[-1]
    lengths_i32 = lengths.astype(jnp.int32)

    grid_spec = pltpu.PrefetchScalarGridSpec(
        num_scalar_prefetch=1,
        grid=(B,),
        in_specs=[
            pl.BlockSpec((1, Kq), lambda b, lens: (b, 0)),
            pl.BlockSpec((1, Kq, T), lambda b, lens: (b, 0, 0)),
            pl.BlockSpec((1, T, C), lambda b, lens: (b, 0, 0)),
        ],
        out_specs=(
            # last dims equal full array dims; attn is lane-dense when T is a
            # multiple of 128.  ctx (C<128) keeps masked stores — tiny per step.
            pl.BlockSpec((1, C), lambda b, lens: (b, 0)),
            pl.BlockSpec((1, T), lambda b, lens: (b, 0)),
        ),
    )
    ctx, attn = pl.pallas_call(
        _attn_step_kernel,
        grid_spec=grid_spec,
        out_shape=(jax.ShapeDtypeStruct((B, C), jnp.float32),
                   jax.ShapeDtypeStruct((B, T), jnp.float32)),
        compiler_params=pltpu.CompilerParams(
            dimension_semantics=("parallel",),
            vmem_limit_bytes=32 * 1024 * 1024),
    )(lengths_i32, q, kT, v)
    return ctx, attn


def attention_forward(listener_output, decoder_state, lengths, params):
    # Per-utterance work (hoist out of the decode loop in real usage).
    kT, v = precompute_kv(listener_output, params['wk'], params['bk'],
                          params['wv'], params['bv'])
    # Per-decoder-step work.
    q = project_query(decoder_state, params['wq'], params['bq'])
    return attention_step(q, kT, v, lengths)


def init_params(key, key_query_val_dim, context_dim, listener_dim, speller_dim):
    ks = jax.random.split(key, 6)
    # Weights stored as (in_dim, out_dim); equivalent to PyTorch Linear weight.T
    return {
        'wq': 0.1 * jax.random.normal(ks[0], (speller_dim, key_query_val_dim), jnp.float32),
        'bq': 0.1 * jax.random.normal(ks[1], (1, key_query_val_dim), jnp.float32),
        'wk': 0.1 * jax.random.normal(ks[2], (listener_dim, key_query_val_dim), jnp.float32),
        'bk': 0.1 * jax.random.normal(ks[3], (1, key_query_val_dim), jnp.float32),
        'wv': 0.1 * jax.random.normal(ks[4], (listener_dim, context_dim), jnp.float32),
        'bv': 0.1 * jax.random.normal(ks[5], (1, context_dim), jnp.float32),
    }


def _reference_forward(listener_output, decoder_state, lengths, params):
    # pure-JAX f32 reference of the PyTorch module
    lr = lambda x: jnp.where(x > 0, x, 0.2 * x)
    q = lr(decoder_state @ params['wq'] + params['bq'])
    k = lr(jnp.einsum('btd,dk->btk', listener_output, params['wk']) + params['bk'])
    v = lr(jnp.einsum('btd,dc->btc', listener_output, params['wv']) + params['bv'])
    energy = jnp.einsum('bk,btk->bt', q, k)
    attn = jax.nn.softmax(energy, axis=-1)
    mask = (jnp.arange(k.shape[1])[None, :] < lengths[:, None]).astype(jnp.float32)
    masked = mask * attn
    denom = jnp.maximum(jnp.sum(jnp.abs(masked), axis=-1, keepdims=True), 1e-12)
    masked_attn = masked / denom
    ctx = jnp.einsum('bt,btc->bc', masked_attn, v)
    return ctx, masked_attn


if __name__ == "__main__":
    B, T = 2, 8
    listener_dim, speller_dim = 32, 32
    key_query_val_dim, context_dim = 16, 16

    key = jax.random.PRNGKey(0)
    k_lo, k_dec, k_par = jax.random.split(key, 3)

    listener_output = jax.random.normal(k_lo, (B, T, listener_dim), jnp.float32)
    decoder_state = jax.random.normal(k_dec, (B, speller_dim), jnp.float32)
    lengths = jnp.array([8, 5], dtype=jnp.int32)

    params = init_params(k_par, key_query_val_dim, context_dim,
                         listener_dim, speller_dim)

    context, masked_attn = attention_forward(listener_output, decoder_state,
                                             lengths, params)
    jax.block_until_ready((context, masked_attn))

    assert context.shape == (B, context_dim)
    assert masked_attn.shape == (B, T)

    # numerical sanity check vs. pure-JAX f32 reference
    # (loose tolerance: matmul operands are bf16 with f32 accumulation)
    ref_ctx, ref_attn = _reference_forward(listener_output, decoder_state,
                                           lengths, params)
    assert bool(jnp.allclose(masked_attn, ref_attn, atol=1e-2, rtol=5e-2))
    assert bool(jnp.allclose(context, ref_ctx, atol=1e-2, rtol=5e-2))

    print("KERNEL_OK")
</pallas_src>

<mosaic_0001>
module attributes {stable_mosaic.version = 11 : i64} {
  func.func @_kv_proj_kernel(%arg0: i32, %arg1: i32, %arg2: memref<1x8x32xf32, #tpu.memory_space<vmem>>, %arg3: memref<32x16xbf16, #tpu.memory_space<vmem>>, %arg4: memref<1x16xf32, #tpu.memory_space<vmem>>, %arg5: memref<32x16xbf16, #tpu.memory_space<vmem>>, %arg6: memref<1x16xf32, #tpu.memory_space<vmem>>, %arg7: memref<1x16x8xbf16, #tpu.memory_space<vmem>>, %arg8: memref<1x8x16xbf16, #tpu.memory_space<vmem>>) attributes {dimension_semantics = [#tpu.dimension_semantics<parallel>, #tpu.dimension_semantics<parallel>], iteration_bounds = array<i64: 2, 1>, scalar_prefetch = 0 : i64, scratch_operands = 0 : i64, tpu.core_type = #tpu.core_type<tc>, window_params = [{transform_indices = @transform_0, window_bounds = array<i64: 1, 8, 32>}, {pipeline_mode = #tpu.pipeline_mode<synchronous>, transform_indices = @transform_1, window_bounds = array<i64: 32, 16>}, {pipeline_mode = #tpu.pipeline_mode<synchronous>, transform_indices = @transform_2, window_bounds = array<i64: 1, 16>}, {pipeline_mode = #tpu.pipeline_mode<synchronous>, transform_indices = @transform_3, window_bounds = array<i64: 32, 16>}, {pipeline_mode = #tpu.pipeline_mode<synchronous>, transform_indices = @transform_4, window_bounds = array<i64: 1, 16>}, {transform_indices = @transform_5, window_bounds = array<i64: 1, 16, 8>}, {transform_indices = @transform_6, window_bounds = array<i64: 1, 8, 16>}]} {
    %c0 = arith.constant 0 : index
    %c0_0 = arith.constant 0 : index
    %c0_1 = arith.constant 0 : index
    %0 = vector.load %arg2[%c0, %c0_0, %c0_1] : memref<1x8x32xf32, #tpu.memory_space<vmem>>, vector<1x8x32xf32>
    %1 = vector.shape_cast %0 : vector<1x8x32xf32> to vector<8x32xf32>
    %2 = arith.truncf %1 : vector<8x32xf32> to vector<8x32xbf16>
    %c0_2 = arith.constant 0 : index
    %c0_3 = arith.constant 0 : index
    %3 = vector.load %arg3[%c0_2, %c0_3] : memref<32x16xbf16, #tpu.memory_space<vmem>>, vector<32x16xbf16>
    %cst = arith.constant dense<0.000000e+00> : vector<8x16xf32>
    %4 = tpu.matmul %2, %3, %cst {dimension_numbers = #tpu.dot_dimension_numbers<[1], [0], [0], [1], [0, 0, 1, 1], [], []>} : vector<8x32xbf16>, vector<32x16xbf16>, vector<8x16xf32> -> vector<8x16xf32>
    %c0_4 = arith.constant 0 : index
    %c0_5 = arith.constant 0 : index
    %5 = vector.load %arg4[%c0_4, %c0_5] : memref<1x16xf32, #tpu.memory_space<vmem>>, vector<1x16xf32>
    %6 = vector.broadcast %5 : vector<1x16xf32> to vector<8x16xf32>
    %7 = arith.addf %4, %6 : vector<8x16xf32>
    %cst_6 = arith.constant 0.000000e+00 : f32
    %8 = vector.broadcast %cst_6 : f32 to vector<8x16xf32>
    %9 = arith.cmpf ogt, %7, %8 : vector<8x16xf32>
    %cst_7 = arith.constant 2.000000e-01 : f32
    %10 = vector.broadcast %cst_7 : f32 to vector<8x16xf32>
    %11 = arith.mulf %10, %7 : vector<8x16xf32>
    %12 = arith.select %9, %7, %11 : vector<8x16xi1>, vector<8x16xf32>
    %13 = tpu.transpose %12, [1, 0] : vector<8x16xf32> -> vector<16x8xf32>
    %14 = arith.truncf %13 : vector<16x8xf32> to vector<16x8xbf16>
    %c0_8 = arith.constant 0 : index
    %c0_9 = arith.constant 0 : index
    %c0_10 = arith.constant 0 : index
    %15 = vector.load %arg7[%c0_8, %c0_9, %c0_10] : memref<1x16x8xbf16, #tpu.memory_space<vmem>>, vector<1x16x8xbf16>
    %16 = vector.shape_cast %15 : vector<1x16x8xbf16> to vector<16x8xbf16>
    %17 = vector.shape_cast %14 : vector<16x8xbf16> to vector<1x16x8xbf16>
    tpu.vector_store %arg7[%c0_8, %c0_9, %c0_10], %17 {strides = array<i32>} : memref<1x16x8xbf16, #tpu.memory_space<vmem>>, vector<1x16x8xbf16>,
    %c0_11 = arith.constant 0 : index
    %c0_12 = arith.constant 0 : index
    %18 = vector.load %arg5[%c0_11, %c0_12] : memref<32x16xbf16, #tpu.memory_space<vmem>>, vector<32x16xbf16>
    %cst_13 = arith.constant dense<0.000000e+00> : vector<8x16xf32>
    %19 = tpu.matmul %2, %18, %cst_13 {dimension_numbers = #tpu.dot_dimension_numbers<[1], [0], [0], [1], [0, 0, 1, 1], [], []>} : vector<8x32xbf16>, vector<32x16xbf16>, vector<8x16xf32> -> vector<8x16xf32>
    %c0_14 = arith.constant 0 : index
    %c0_15 = arith.constant 0 : index
    %20 = vector.load %arg6[%c0_14, %c0_15] : memref<1x16xf32, #tpu.memory_space<vmem>>, vector<1x16xf32>
    %21 = vector.broadcast %20 : vector<1x16xf32> to vector<8x16xf32>
    %22 = arith.addf %19, %21 : vector<8x16xf32>
    %cst_16 = arith.constant 0.000000e+00 : f32
    %23 = vector.broadcast %cst_16 : f32 to vector<8x16xf32>
    %24 = arith.cmpf ogt, %22, %23 : vector<8x16xf32>
    %cst_17 = arith.constant 2.000000e-01 : f32
    %25 = vector.broadcast %cst_17 : f32 to vector<8x16xf32>
    %26 = arith.mulf %25, %22 : vector<8x16xf32>
    %27 = arith.select %24, %22, %26 : vector<8x16xi1>, vector<8x16xf32>
    %28 = arith.truncf %27 : vector<8x16xf32> to vector<8x16xbf16>
    %c0_18 = arith.constant 0 : index
    %c0_19 = arith.constant 0 : index
    %c0_20 = arith.constant 0 : index
    %29 = vector.load %arg8[%c0_18, %c0_19, %c0_20] : memref<1x8x16xbf16, #tpu.memory_space<vmem>>, vector<1x8x16xbf16>
    %30 = vector.shape_cast %29 : vector<1x8x16xbf16> to vector<8x16xbf16>
    %31 = vector.shape_cast %28 : vector<8x16xbf16> to vector<1x8x16xbf16>
    tpu.vector_store %arg8[%c0_18, %c0_19, %c0_20], %31 {strides = array<i32>} : memref<1x8x16xbf16, #tpu.memory_space<vmem>>, vector<1x8x16xbf16>,
    return
  }
  func.func @transform_0(%arg0: i32, %arg1: i32) -> (i32, i32, i32) {
    %c0_i32 = arith.constant 0 : i32
    %c0_i32_0 = arith.constant 0 : i32
    return %arg0, %arg1, %c0_i32 : i32, i32, i32
  }
  func.func @transform_1(%arg0: i32, %arg1: i32) -> (i32, i32) {
    %c0_i32 = arith.constant 0 : i32
    %c0_i32_0 = arith.constant 0 : i32
    %c0_i32_1 = arith.constant 0 : i32
    return %c0_i32, %c0_i32_0 : i32, i32
  }
  func.func @transform_2(%arg0: i32, %arg1: i32) -> (i32, i32) {
    %c0_i32 = arith.constant 0 : i32
    %c0_i32_0 = arith.constant 0 : i32
    %c0_i32_1 = arith.constant 0 : i32
    return %c0_i32, %c0_i32_0 : i32, i32
  }
  func.func @transform_3(%arg0: i32, %arg1: i32) -> (i32, i32) {
    %c0_i32 = arith.constant 0 : i32
    %c0_i32_0 = arith.constant 0 : i32
    %c0_i32_1 = arith.constant 0 : i32
    return %c0_i32, %c0_i32_0 : i32, i32
  }
  func.func @transform_4(%arg0: i32, %arg1: i32) -> (i32, i32) {
    %c0_i32 = arith.constant 0 : i32
    %c0_i32_0 = arith.constant 0 : i32
    %c0_i32_1 = arith.constant 0 : i32
    return %c0_i32, %c0_i32_0 : i32, i32
  }
  func.func @transform_5(%arg0: i32, %arg1: i32) -> (i32, i32, i32) {
    %c0_i32 = arith.constant 0 : i32
    %c0_i32_0 = arith.constant 0 : i32
    return %arg0, %c0_i32, %arg1 : i32, i32, i32
  }
  func.func @transform_6(%arg0: i32, %arg1: i32) -> (i32, i32, i32) {
    %c0_i32 = arith.constant 0 : i32
    %c0_i32_0 = arith.constant 0 : i32
    return %arg0, %arg1, %c0_i32 : i32, i32, i32
  }
}

</mosaic_0001>

<bundles_post_ra>
// kernel: tpu_custom_call.1
= control target key start
LH: loop header
LB: loop body
LE: loop exit
PB: predicated region body
PF: predicated region fallthrough
CT: control target
= control target key end

     0   :  { %12 = vsyncpa [#allocation3], 0  ;;  %s972_s0 = inlined_call_operand.vmem [shape: f32[2,8,32], index: 0, kind: input, shape index: {}]   ;;  %s973_s1 = inlined_call_operand.vmem [shape: bf16[32,16], index: 1, kind: input, shape index: {}]   ;;  %s974_s2 = inlined_call_operand.vmem [shape: f32[1,16], index: 2, kind: input, shape index: {}]   ;;  %s975_s3 = inlined_call_operand.vmem [shape: bf16[32,16], index: 3, kind: input, shape index: {}]   ;;  %s976_s4 = inlined_call_operand.vmem [shape: f32[1,16], index: 4, kind: input, shape index: {}]   ;;  %s977_s5 = inlined_call_operand.vmem [shape: bf16[2,16,8], index: 5, kind: output, shape index: {0}]   ;;  %s978_s6 = inlined_call_operand.hbm [shape: bf16[2,8,16], index: 6, kind: output, shape index: {1}]  }
   0x1   :  { %14 = vsyncpa [#allocation3 + $0x1], 0  ;;  %s838_s21 = smov 0   ;;  %s840_s22 = smov 0  }
   0x2   :  { %s842_s23 = smov 0   ;;  %s844_s24 = smov 0  }
   0x3   :  { %s846_s25 = smov 0   ;;  %s848_s26 = smov 0  }
   0x4 LB: > { %s611_s27 = sadd.s32 4294967295, %s798_s26   ;;  %s612_s28 = sadd.s32 4294967294, %s798_s26   ;;  %s798_s26 = sphi %s848_s26, %s20_s26   ;;  %s794_s25 = sphi %s846_s25, %s987_s25   ;;  %s790_s24 = sphi %s844_s24, %s986_s24   ;;  %s786_s23 = sphi %s842_s23, %s985_s23   ;;  %s782_s22 = sphi %s840_s22, %s984_s22   ;;  %s778_s21 = sphi %s838_s21, %s983_s21  }
   0x5   : > { %s32_s29 = sadd.s32 1, %s794_s25  ;;  %s181_s30 = sadd.s32 1, %s786_s23 }
   0x6   : > { %p34_p0 = scmp.ge.s32.totalorder %s32_s29, 2  ;;  %p191_p1 = scmp.ne.s32.totalorder %s786_s23, %s782_s22 }
   0x7   : > { %p192_p2 = scmp.eq.s32.totalorder %s611_s27, 1  ;;  %p197_p3 = scmp.ne.s32.totalorder %s782_s22, %s778_s21 }
   0x8   : > { %s989_s29 = smov (%p34_p0, %s32_s29), 0  ;;  %p198_p5 = scmp.eq.s32.totalorder %s612_s28, 1 }
   0x9   : > { %p878_p4 = por %p192_p2, %p191_p1  ;;  %s176_s8 = ssub.s32 %s794_s25, %s989_s29 }
   0xa   : > { %p615_p6 = scmp.ge.s32.totalorder %s798_s26, 1  ;;  %p179_p7 = scmp.eq.s32.totalorder %s176_s8, 0 }
   0xb   : > { %p885_p8 = por %p198_p5, %p197_p3  ;;  %p238_p9 = scmp.lt.s32.totalorder %s798_s26, 3 }
   0xc   : > { %s891_s10 = scalar_select %p179_p7, %s786_s23, %s181_s30  }
   0xd   : > { %p239_p10 = pnand %p615_p6, %p238_p9 }
   0xe   : > { %v716_v0 = vld [vmem:[%s973_s1] sm:$0xff] (!%p239_p10)   ;;  %v800_v1 = vmov (!%p239_p10), 0.0   ;;  %v717_v2 = vld [vmem:[%s973_s1 + $0x8] sm:$0xff] (!%p239_p10)   ;;  %vm801_vm0 = vmmov (!%p239_p10), 0   ;;  %p278_p11 = scmp.lt.s32.totalorder (!%p239_p10), %s790_s24, 1  ;;  %vm319_vm1 = vcmask (!%p239_p10), 261120  }
   0xf   : > { %242 = sbr.rel (%p239_p10) target bundleno = 382 (0x17e), region = 40  ;;  %643 = vmatprep.subr.bf16.mxu0 (!%p239_p10), %v800_v1  ;;  %651 = vmatprep.subr.bf16.mxu1 (!%p239_p10), %v800_v1  ;;  %v718_v3 = vld [vmem:[%s975_s3] sm:$0xff] (!%p239_p10)   ;;  %v719_v4 = vld [vmem:[%s975_s3 + $0x8] sm:$0xff] (!%p239_p10)   ;;  %s275_s14 = sand.u32 (!%p239_p10), 1, %s782_s22   ;;  %vm476_vm4 = vcmask (!%p239_p10), 125952  }
  0x10   : > { %644 = vmatpush3.bf16.msra.mxu0 (!%p239_p10), %v716_v0  ;;  %647 = vmatprep.mubr.msk.bf16.mxu0 (!%p239_p10), %vm801_vm0, %v800_v1  ;;  %v620_v7 = vld [vmem:[%s974_s2] ss:$0 sm:$0xff] (!%p239_p10)  ;;  %s616_s15 = sshll.u32 (!%p239_p10), %s275_s14, 2  ;;  %s631_s18 = sshll.u32 (!%p239_p10), %s790_s24, 6 }
  0x11   : > { %645 = vmatprep.subr.bf16.mxu0 (!%p239_p10), %v800_v1  ;;  %655 = vmatprep.mubr.msk.bf16.mxu1 (!%p239_p10), %vm801_vm0, %v800_v1  ;;  %v626_v8 = vld [vmem:[%s976_s4] ss:$0 sm:$0xff] (!%p239_p10)  ;;  %s277_s16 = scalar_lea.vmem (!%p239_p10), [#allocation2], %s616_s15  ;;  %s487_s8 = scalar_lea.sflag (!%p239_p10), [#allocation3], %s275_s14 }
  0x12   : > { %652 = vmatpush3.bf16.msra.mxu1 (!%p239_p10), %v718_v3  ;;  %s504_s19 = sshll.u32 (!%p239_p10), %s277_s16, 4  ;;  %s802_s12 = smov (!%p239_p10), [#allocation2]   ;;  %s505_s19 = int_to_ptr.vmem [resolvable:$true] %s504_s19 }
  0x13   : > { %653 = vmatprep.subr.bf16.mxu1 (!%p239_p10), %v800_v1  ;;  %s720_s11 = scalar_lea.vmem (!%p239_p10), %s505_s19, 64  ;;  %s724_s13 = sshll.u32 (!%p239_p10), %s802_s12, 4  ;;  %s725_s13 = int_to_ptr.vmem [resolvable:$false] %s724_s13 }
  0x14   : > { %646 = vmatpush3.bf16.msra.mxu0 (!%p239_p10), %v717_v2  ;;  %p721_p12 = scmp.ne.s32.totalorder (!%p239_p10), %s505_s19, %s720_s11  ;;  %p727_p1 = scmp.lt.s32.totalorder (!%p239_p10), %s505_s19, %s725_s13 }
  0x16   : > { %s904_s17 = scalar_select %p278_p11, %s790_s24, 1  ;;  %654 = vmatpush3.bf16.msra.mxu1 %v719_v4 }
  0x17   : > { %p722_p13 = pnand %p721_p12, %p878_p4 }
  0x18   : > { %s979_s20 = sshll.u32 %s904_s17, 3 }
  0x19   : > { %s284_s30 = scalar_lea.vmem %s972_s0, %s979_s20  ;;  %p723_p0 = pneg %p722_p13 }
  0x1a   : > { %v294_v5 = vld [vmem:[%s284_s30] sm:$0xff]  ;;  %s926_s30 = scalar_lea.hbm %s978_s6, %s631_s18  ;;  %s726_s20 = scalar_lea.vmem %s725_s13, 128 }
  0x1b   : > { %v295_v6 = vpack.c.bf16 %v294_v5, %v294_v5  ;;  %p728_p2 = scmp.lt.s32.totalorder %s726_s20, %s720_s11 }
  0x1d   : > { %648 = vmatmul.mubr.msk.bf16.vlgmr.msra.gmra.mrb[0].mxu0 %vm319_vm1, %v295_v6  ;;  %656 = vmatmul.mubr.msk.bf16.vlgmr.msra.gmra.mrb[0].mxu1 %vm319_vm1, %v295_v6  ;;  %p729_p3 = por %p728_p2, %p727_p1 }
  0x1f   : > { %p730_p5 = pnand %p729_p3, %p723_p0 }
  0xf0   : > { %v357_v9 = vpop.f32.mrb[0].mxu0  ;;  %v466_v12 = vpop.f32.mrb[0].mxu1 }
  0xf1   : > { %v358_v10 = vadd.f32 %v620_v7, %v357_v9  ;;  %v649_v11 = vpop.f32.mrb[1].mxu0  ;;  %v467_v14 = vadd.f32 %v626_v8, %v466_v12  ;;  %v657_v15 = vpop.f32.mrb[1].mxu1 }
  0xf2   : > { %v360_v13 = vpop.f32.mrb[2].mxu0  ;;  %v469_v18 = vpop.f32.mrb[2].mxu1 }
  0xf3   : > { %v650_v16 = vpop.f32.mrb[3].mxu0  ;;  %vm363_vm2 = vcmp.gt.f32.partialorder %v358_v10, 0.0  ;;  %v364_v17 = vmul.f32 0.2, %v358_v10  ;;  %vm472_vm3 = vcmp.gt.f32.partialorder %v467_v14, 0.0  ;;  %v658_v20 = vpop.f32.mrb[3].mxu1 }
  0xf4   : > { %v473_v19 = vmul.f32 0.2, %v467_v14 }
  0xf5   : > { %v365_v21 = vsel %vm363_vm2, %v358_v10, %v364_v17 }
  0xf6   : > { %366 = vxpose.xlu0.b32.start.end [1/1] (short) (narrow) %v365_v21, 16  ;;  %v474_v22 = vsel %vm472_vm3, %v467_v14, %v473_v19 }
  0xf7   : > { %v475_v23 = vpack.c.bf16 %v474_v22, %v474_v22 }
  0xf9   : > { %477 = vst.msk [vmem:[%s277_s16] sm:$0xf] %vm476_vm4, %v475_v23 }
  0xfa   : > { %733 = shalt.err (!%p730_p5)
}
  0xfb   : > { %s734_s24 = scalar_lea.hbm %s926_s30, 64  ;;  %s738_s16 = scalar_lea.hbm %s978_s6, 128 }
  0xfc   : > { %p735_p6 = scmp.ne.s32.totalorder %s926_s30, %s734_s24  ;;  %p739_p10 = scmp.lt.u32.totalorder %s926_s30, %s978_s6 }
  0xfd   : > { %p740_p11 = scmp.lt.u32.totalorder %s738_s16, %s734_s24  ;;  %p742_p13 = scmp.lt.u32.totalorder %s734_s24, %s926_s30 }
  0xfe   : > { %p736_p7 = pnand %p735_p6, %p878_p4 }
  0xff   : > { %p741_p12 = por %p740_p11, %p739_p10 }
 0x100   : > { %p737_p9 = pneg %p736_p7 }
 0x101   : > { %p743_p0 = por %p742_p13, %p741_p12 }
 0x103   : > { %p744_p1 = pnand %p743_p0, %p737_p9 }
 0x105   : > { %747 = shalt.err (!%p744_p1)
}
 0x106   : > { %659 = dma.vmem_to_hbm [thread:$0]  (%p878_p4), %s505_s19, 64, %s926_s30, %s487_s8   ;;  %vm406_vm5 = vcmask 60416  }
 0x107   : > { %s982_s20 = sshll.u32 %s904_s17, 3 }
 0x108   : > { %s292_s12 = scalar_lea.vmem %s977_s5, %s982_s20 }
 0x176   : > { %v382_v24 = vpop.trf.xlu0 }
 0x177   : > { %v635_v25 = vpack.c.bf16 %v382_v24, %v382_v24 }
 0x179   : > { %407 = vst.msk [vmem:[%s292_s12] sm:$0xf] %vm406_vm5, %v635_v25 }
 0x17a   : > { %v383_v26 = vpop.trf.xlu0 }
 0x17b   : > { %v636_v27 = vpack.c.bf16 %v383_v26, %v383_v26 }
 0x17d   : > { %408 = vst.msk [vmem:[%s292_s12 + $0x4] sm:$0xf] %vm406_vm5, %v636_v27 }
 0x17e PF: > { %p665_p2 = scmp.ge.s32.totalorder %s798_s26, 2  ;;  %s527_s7 = sand.u32 1, %s778_s21  }
 0x17f   : > { %s528_s17 = scalar_lea.sflag [#allocation3], %s527_s7 }
 0x180   : > { %p662_p4 = pnand %p665_p2, %p885_p8 }
 0x182   : > { %773 = dma.done.wait (!%p662_p4), %s528_s17, 64  }
 0x183   : > { %775 = vsyncadd (!%p662_p4), %s528_s17, 4294967232  ;;  %s20_s26 = sadd.s32 1, %s798_s26   ;;  %s983_s21 = smov %s782_s22 }
 0x184   : > { %p17_p3 = scmp.ge.s32.totalorder %s20_s26, 4   ;;  %s984_s22 = smov %s786_s23 }
 0x185   : > { %s985_s23 = smov %s891_s10  ;;  %s986_s24 = smov %s794_s25 }
 0x186   : > { %s987_s25 = smov %s989_s29  ;;  %19 = sbr.rel (!%p17_p3) target bundleno = 4 (0x4), region = 87 }
 0x18d   :  { %533 = vsyncpa [#allocation3], 1 }
 0x18e   :  { %535 = vsyncpa [#allocation3 + $0x1], 1 }

</bundles_post_ra>
